<compile_context>
chip_gen: v5e
topology: v5e:2x2
jax: 0.10.0
libtpu: 0.0.40
codegen_flags: <defaults>
</compile_context>

<pallas_src>
import functools
import math

import jax
import jax.numpy as jnp
from jax.experimental import pallas as pl
from jax.experimental.pallas import tpu as pltpu


def _pe_kernel(seed_ref, x_ref, pe_ref, o_ref, *, p, training):
    # x_ref: (tS, B, D) VMEM, pe_ref: (tS, D) VMEM, seed_ref: (1,) SMEM
    x = x_ref[...].astype(jnp.float32)
    pe = pe_ref[...].astype(jnp.float32)
    y = x + pe[:, None, :]                      # broadcast over batch axis
    if training and p > 0.0:
        # Per-tile seed so different grid steps draw independent masks.
        pltpu.prng_seed(seed_ref[0] + pl.program_id(0))
        bits = pltpu.bitcast(pltpu.prng_random_bits(y.shape), jnp.uint32)
        thresh = jnp.uint32(min(int(p * (2.0 ** 32)), 2 ** 32 - 1))
        keep = bits >= thresh                   # keep prob ~= 1 - p
        y = jnp.where(keep, y * (1.0 / (1.0 - p)), 0.0)
    o_ref[...] = y.astype(o_ref.dtype)


def make_pe_table(max_len, d_model, dtype=jnp.float32):
    """Deterministic positional-encoding table, same math as the torch __init__."""
    position = jnp.arange(max_len, dtype=jnp.float32)[:, None]            # (max_len, 1)
    div_term = jnp.exp(
        jnp.arange(0, d_model, 2, dtype=jnp.float32) * (-math.log(10000.0) / d_model)
    )                                                                      # (d_model/2,)
    pe = jnp.zeros((max_len, d_model), dtype=jnp.float32)
    pe = pe.at[:, 0::2].set(jnp.sin(position * div_term))
    pe = pe.at[:, 1::2].set(jnp.cos(position * div_term))
    return pe.astype(dtype)                                                # (max_len, d_model)


def _round_down8(n):
    return (n // 8) * 8


def _round_up8(n):
    return ((n + 7) // 8) * 8


def positional_encoding(x, pe_table, *, p=0.1, training=False, seed=0, block_s=None):
    """x: (S, B, D). Returns x + pe_table[:S] (broadcast over batch), with optional dropout.

    pe_table: (max_len, D) as built by make_pe_table (passed whole; only the
    needed (tS, D) blocks are streamed into VMEM by the grid).
    """
    S, B, D = x.shape
    max_len, Dp = pe_table.shape
    assert Dp == D and S <= max_len
    if training:
        assert 0.0 <= p < 1.0, "dropout probability must be in [0, 1)"

    # --- tile size over the sequence axis -----------------------------------
    # Double-buffered live VMEM ~= 2 * tS * (x_row + out_row + pe_row) bytes.
    x_bytes = jnp.dtype(x.dtype).itemsize
    pe_bytes = jnp.dtype(pe_table.dtype).itemsize
    bytes_per_row = 2 * B * D * x_bytes + D * pe_bytes
    vmem_budget = 32 * 1024 * 1024          # conservative: fits v7x's 64 MiB VMEM
    if block_s is None:
        tS = max(8, _round_down8(vmem_budget // (2 * bytes_per_row)))
    else:
        tS = max(8, _round_down8(block_s))
    tS = min(tS, _round_up8(S))             # never bigger than (padded) S
    grid = (pl.cdiv(S, tS),)

    seed_arr = jnp.asarray([seed], dtype=jnp.int32)
    kernel = functools.partial(_pe_kernel, p=float(p), training=bool(training))

    return pl.pallas_call(
        kernel,
        out_shape=jax.ShapeDtypeStruct((S, B, D), x.dtype),
        grid=grid,
        in_specs=[
            pl.BlockSpec(memory_space=pltpu.MemorySpace.SMEM),      # seed scalar
            pl.BlockSpec((tS, B, D), lambda i: (i, 0, 0)),          # x tile
            pl.BlockSpec((tS, D), lambda i: (i, 0)),                # pe tile (tiny stream)
        ],
        out_specs=pl.BlockSpec((tS, B, D), lambda i: (i, 0, 0)),
        compiler_params=pltpu.CompilerParams(
            dimension_semantics=("parallel",),                      # megacore on v7x
            vmem_limit_bytes=48 * 1024 * 1024,
        ),
    )(seed_arr, x, pe_table)


if __name__ == "__main__":
    key = jax.random.PRNGKey(0)

    # --- test 1: module-like small shape, single grid step ------------------
    S, B, D = 8, 2, 32
    MAX_LEN = 64
    x = jax.random.normal(key, (S, B, D), dtype=jnp.float32)
    pe_table = make_pe_table(MAX_LEN, D)

    out = jax.block_until_ready(positional_encoding(x, pe_table, p=0.1, training=False))
    ref = x + pe_table[:S][:, None, :]
    assert out.shape == (S, B, D)
    assert jnp.allclose(out, ref, atol=1e-6, rtol=1e-6)

    # --- test 2: multi-step grid (forced small tile) exercises pipelining ---
    S2 = 24
    x2 = jax.random.normal(jax.random.PRNGKey(1), (S2, B, D), dtype=jnp.float32)
    out2 = jax.block_until_ready(
        positional_encoding(x2, pe_table, p=0.1, training=False, block_s=8)
    )
    ref2 = x2 + pe_table[:S2][:, None, :]
    assert out2.shape == (S2, B, D)
    assert jnp.allclose(out2, ref2, atol=1e-6, rtol=1e-6)

    # Training-mode dropout (pltpu.prng_*) is implemented above but not run
    # here: the TPU hardware PRNG has no CPU/interpret lowering, and the eval
    # path is the module's deterministic forward.

    print("KERNEL_OK")
</pallas_src>

<mosaic_0001>
module attributes {stable_mosaic.version = 11 : i64} {
  func.func @_pe_kernel(%arg0: i32, %arg1: memref<1xi32, #tpu.memory_space<smem>>, %arg2: memref<8x2x32xf32, #tpu.memory_space<vmem>>, %arg3: memref<8x32xf32, #tpu.memory_space<vmem>>, %arg4: memref<8x2x32xf32, #tpu.memory_space<vmem>>) attributes {dimension_semantics = [#tpu.dimension_semantics<parallel>], iteration_bounds = array<i64: 1>, scalar_prefetch = 0 : i64, scratch_operands = 0 : i64, tpu.core_type = #tpu.core_type<tc>, window_params = [{transform_indices = @transform_0, window_bounds = array<i64: 1>}, {transform_indices = @transform_1, window_bounds = array<i64: 8, 2, 32>}, {transform_indices = @transform_2, window_bounds = array<i64: 8, 32>}, {transform_indices = @transform_3, window_bounds = array<i64: 8, 2, 32>}]} {
    %c0 = arith.constant 0 : index
    %c0_0 = arith.constant 0 : index
    %c0_1 = arith.constant 0 : index
    %0 = vector.load %arg2[%c0, %c0_0, %c0_1] : memref<8x2x32xf32, #tpu.memory_space<vmem>>, vector<8x2x32xf32>
    %c0_2 = arith.constant 0 : index
    %c0_3 = arith.constant 0 : index
    %1 = vector.load %arg3[%c0_2, %c0_3] : memref<8x32xf32, #tpu.memory_space<vmem>>, vector<8x32xf32>
    %2 = vector.shape_cast %1 : vector<8x32xf32> to vector<8x1x32xf32>
    %3 = vector.broadcast %2 : vector<8x1x32xf32> to vector<8x2x32xf32>
    %4 = arith.addf %0, %3 : vector<8x2x32xf32>
    %c0_4 = arith.constant 0 : index
    %c0_5 = arith.constant 0 : index
    %c0_6 = arith.constant 0 : index
    %5 = vector.load %arg4[%c0_4, %c0_5, %c0_6] : memref<8x2x32xf32, #tpu.memory_space<vmem>>, vector<8x2x32xf32>
    tpu.vector_store %arg4[%c0_4, %c0_5, %c0_6], %4 {strides = array<i32>} : memref<8x2x32xf32, #tpu.memory_space<vmem>>, vector<8x2x32xf32>,
    return
  }
  func.func @transform_0(%arg0: i32) -> i32 {
    %c0_i32 = arith.constant 0 : i32
    %c0_i32_0 = arith.constant 0 : i32
    return %c0_i32 : i32
  }
  func.func @transform_1(%arg0: i32) -> (i32, i32, i32) {
    %c0_i32 = arith.constant 0 : i32
    %c0_i32_0 = arith.constant 0 : i32
    %c0_i32_1 = arith.constant 0 : i32
    return %arg0, %c0_i32, %c0_i32_0 : i32, i32, i32
  }
  func.func @transform_2(%arg0: i32) -> (i32, i32) {
    %c0_i32 = arith.constant 0 : i32
    %c0_i32_0 = arith.constant 0 : i32
    return %arg0, %c0_i32 : i32, i32
  }
  func.func @transform_3(%arg0: i32) -> (i32, i32, i32) {
    %c0_i32 = arith.constant 0 : i32
    %c0_i32_0 = arith.constant 0 : i32
    %c0_i32_1 = arith.constant 0 : i32
    return %arg0, %c0_i32, %c0_i32_0 : i32, i32, i32
  }
}

</mosaic_0001>

<bundles_post_ra>
// kernel: tpu_custom_call.1
= control target key start
LH: loop header
LB: loop body
LE: loop exit
PB: predicated region body
PF: predicated region fallthrough
CT: control target
= control target key end

     0   :  { %vm57_vm0 = vcmask 254976   ;;  %s174_s0 = inlined_call_operand.<no memory space> [shape: s32[1], index: 0, kind: input, shape index: {}]   ;;  %s175_s1 = inlined_call_operand.vmem [shape: f32[8,2,32], index: 1, kind: input, shape index: {}]   ;;  %s176_s2 = inlined_call_operand.vmem [shape: f32[64,32], index: 2, kind: input, shape index: {}]   ;;  %s177_s3 = inlined_call_operand.hbm [shape: f32[8,2,32], index: 3, kind: output, shape index: {}]  }
   0x1   :  { %v16_v0 = vld [vmem:[%s175_s1] sm:$0x3]  ;;  %v17_v2 = vld [vmem:[%s175_s1 + $0x2] sm:$0x3]  ;;  %v18_v5 = vld [vmem:[%s175_s1 + $0x4] sm:$0x3] }
   0x2   :  { %v24_v1 = vld [vmem:[%s176_s2] sm:$0xff]  ;;  %v20_v9 = vld [vmem:[%s175_s1 + $0x8] sm:$0x3]  ;;  %v21_v16 = vld [vmem:[%s175_s1 + $0xa] sm:$0x3] }
   0x3   :  { %v33_v3 = vperm.slane %v24_v1, 0  ;;  %v26_v4 = vrot.slane %v24_v1, 1  ;;  %v27_v6 = vrot.slane %v24_v1, 2  ;;  %v28_v7 = vrot.slane %v24_v1, 3  ;;  %v19_v8 = vld [vmem:[%s175_s1 + $0x6] sm:$0x3] }
   0x4   :  { %v29_v10 = vrot.slane %v24_v1, 4  ;;  %v30_v11 = vrot.slane %v24_v1, 5  ;;  %v31_v19 = vrot.slane %v24_v1, 6  ;;  %v32_v20 = vrot.slane %v24_v1, 7  ;;  %v22_v24 = vld [vmem:[%s175_s1 + $0xc] sm:$0x3] }
   0x5   :  { %v49_v12 = vadd.f32 %v33_v3, %v16_v0  ;;  %v34_v13 = vperm.slane %v26_v4, 0  ;;  %v35_v14 = vperm.slane %v27_v6, 0  ;;  %v36_v15 = vperm.slane %v28_v7, 0 }
   0x6   :  { %v37_v17 = vperm.slane %v29_v10, 0  ;;  %v38_v18 = vperm.slane %v30_v11, 0 }
   0x7   :  { %58 = vst.msk [vmem:[#allocation3] sm:$0x3] %vm57_vm0, %v49_v12  ;;  %v50_v21 = vadd.f32 %v34_v13, %v17_v2  ;;  %v51_v22 = vadd.f32 %v35_v14, %v18_v5  ;;  %v52_v23 = vadd.f32 %v36_v15, %v19_v8 }
   0x8   :  { %9 = vsyncpa [#allocation4], 0  ;;  %v53_v25 = vadd.f32 %v37_v17, %v20_v9  ;;  %v39_v26 = vperm.slane %v31_v19, 0  ;;  %v23_v27 = vld [vmem:[%s175_s1 + $0xe] sm:$0x3]  ;;  %v40_v28 = vperm.slane %v32_v20, 0  ;;  %v54_v29 = vadd.f32 %v38_v18, %v21_v16 }
   0x9   :  { %59 = vst.msk [vmem:[#allocation3 + $0x2] sm:$0x3] %vm57_vm0, %v50_v21  ;;  %s113_s28 = smov [#allocation3]   ;;  %s72_s5 = sshll.u32 %s177_s3, 4  ;;  %s73_s5 = int_to_ptr.hbm [resolvable:$true] %s72_s5 }
   0xa   :  { %s70_s29 = sshll.u32 %s113_s28, 4  ;;  %60 = vst.msk [vmem:[#allocation3 + $0x4] sm:$0x3] %vm57_vm0, %v51_v22  ;;  %v55_v30 = vadd.f32 %v39_v26, %v22_v24  ;;  %v56_v31 = vadd.f32 %v40_v28, %v23_v27  ;;  %s114_s1 = smov 32   ;;  %s71_s29 = int_to_ptr.vmem [resolvable:$true] %s70_s29 }
   0xb   :  { %61 = vst.msk [vmem:[#allocation3 + $0x6] sm:$0x3] %vm57_vm0, %v52_v23  ;;  %s115_s6 = smov 2  }
   0xc   :  { %62 = vst.msk [vmem:[#allocation3 + $0x8] sm:$0x3] %vm57_vm0, %v53_v25 }
   0xd   :  { %63 = vst.msk [vmem:[#allocation3 + $0xa] sm:$0x3] %vm57_vm0, %v54_v29 }
   0xe   :  { %64 = vst.msk [vmem:[#allocation3 + $0xc] sm:$0x3] %vm57_vm0, %v55_v30 }
   0xf   :  { %65 = vst.msk [vmem:[#allocation3 + $0xe] sm:$0x3] %vm57_vm0, %v56_v31 }
  0x10   :  { %78 = dma.vmem_to_hbm [thread:$0]  %s71_s29, 256, %s73_s5, [#allocation4], %s114_s1, %s114_s1, %s115_s6  }
  0x11   :  { %111 = dma.done.wait [#allocation4], 256  }
  0x12   :  { %112 = vsyncadd [#allocation4], 4294967040 }
  0x13   :  { %83 = vsyncpa [#allocation4], 1 }

</bundles_post_ra>
